<compile_context>
chip_gen: v7x
topology: tpu7x:2x2x1
jax: 0.10.0
libtpu: 0.0.40
codegen_flags: <defaults>
</compile_context>

<pallas_src>
import functools
import math

import jax
import jax.numpy as jnp
from jax import lax
from jax.experimental import pallas as pl
from jax.experimental.pallas import tpu as pltpu


def _decoder_kernel(x_ref, w1_ref, p_ref, noise_ref, out_ref, *, inv_temp):
    """One batch tile of: Linear -> LeakyReLU -> Linear -> Sigmoid -> RelaxedBernoulli.rsample()."""
    x = x_ref[...]                                     # (TB, Din)  (bf16 or f32)
    b1 = p_ref[0:1, :]                                 # (1, H)  bias of Linear_1  (f32)
    w2_row = p_ref[1:2, :]                             # (1, H)  Linear_2 weight as a row
    b2 = p_ref[2:3, 0:1]                               # (1, 1)  bias of Linear_2

    # Linear 1 on the MXU, f32 accumulation.
    h = jnp.dot(x, w1_ref[...], preferred_element_type=jnp.float32) + b1   # (TB, H) f32
    # LeakyReLU (PyTorch default negative_slope = 0.01).
    h = jnp.maximum(h, 0.01 * h)

    # Linear 2 (single output feature): contract H of (1,H) with H of (TB,H)
    # -> lane-dense (1, TB) so the whole tail and the store stay lane-dense.
    z = lax.dot_general(
        w2_row, h, (((1,), (1,)), ((), ())), preferred_element_type=jnp.float32
    ) + b2                                             # (1, TB)

    # Final Sigmoid of the nn.Sequential; its output is then (faithfully to
    # the quirky PyTorch module) used as the RelaxedBernoulli "logits".
    logits = jax.nn.sigmoid(z)

    # Reparameterized relaxed-Bernoulli sample with precomputed logistic noise.
    out_ref[...] = jax.nn.sigmoid((logits + noise_ref[...]) * inv_temp)     # (1, TB)


def _num_tensorcores():
    """Best-effort TensorCore-per-chip count (2 on v7x, else 1)."""
    try:
        kind = jax.devices()[0].device_kind.lower()
    except Exception:  # interpret / no device info
        return 1
    return 2 if ("v7" in kind or "7x" in kind) else 1


def _batch_tile(batch, num_cores):
    """Biggest tile that divides the batch; only force >=2 grid steps on 2-TC
    chips (v7x).  At Din ~ O(100) even 4096-row f32 tiles are < 2 MiB
    double-buffered, far under the 32 MiB scoped / 64 MiB physical v7x VMEM."""
    ladder = (4096, 2048, 1024, 512, 256, 128)
    if num_cores >= 2:
        for tb in ladder:
            if batch % tb == 0 and batch // tb >= num_cores:
                return tb
    for tb in ladder:
        if batch % tb == 0:
            return tb
    return batch  # full-array block (always layout-legal)


def decoder_forward(n_h, w1, b1, w2, b2, temperature, noise_key,
                    activation_dtype=jnp.bfloat16):
    """Full Decoder forward pass in a single batch-gridded Pallas kernel.

    n_h: (B, Din)   w1: (Din, H)   b1: (1, H)   w2: (H, 1)   b2: (1, 1)
    returns: (B, 1) f32 relaxed-Bernoulli sample in (0, 1)
    """
    B, Din = n_h.shape
    H = w1.shape[1]
    TB = _batch_tile(B, _num_tensorcores())
    grid = (B // TB,)
    inv_temp = 1.0 / float(temperature)

    # Fold the three small parameter tensors into one VMEM-resident f32 slab:
    # row 0 = b1, row 1 = w2 (as a row), row 2 = b2 broadcast across H.
    params = jnp.concatenate(
        [
            b1.reshape(1, H).astype(jnp.float32),
            w2.reshape(1, H).astype(jnp.float32),
            jnp.broadcast_to(b2.reshape(1, 1).astype(jnp.float32), (1, H)),
        ],
        axis=0,
    )                                                  # (3, H)

    # Logistic noise L = log(u) - log(1-u), generated in the host graph so the
    # kernel has no TPU-only PRNG dependency (also works under interpret mode).
    # One f32 word per sample, laid out lane-dense as (1, B).
    # TODO(synk): not bit-comparable with torch's clamp_probs uniform path.
    noise = jax.random.logistic(noise_key, (1, B), jnp.float32)

    act = n_h.astype(activation_dtype)
    w1a = w1.astype(activation_dtype)
    act_bytes = jnp.dtype(activation_dtype).itemsize

    kernel = functools.partial(_decoder_kernel, inv_temp=inv_temp)

    out_row = pl.pallas_call(
        kernel,
        out_shape=jax.ShapeDtypeStruct((1, B), jnp.float32),
        grid_spec=pltpu.PrefetchScalarGridSpec(
            num_scalar_prefetch=0,
            grid=grid,
            in_specs=[
                # activation stream: tiled over batch
                pl.BlockSpec((TB, Din), lambda i: (i, 0)),
                # weights / params: constant block index -> stay VMEM-resident
                pl.BlockSpec((Din, H), lambda i: (0, 0)),
                pl.BlockSpec((3, H), lambda i: (0, 0)),
                # per-sample logistic noise, lane-dense
                pl.BlockSpec((1, TB), lambda i: (0, i)),
            ],
            # lane-dense output slab (unmasked stores)
            out_specs=pl.BlockSpec((1, TB), lambda i: (0, i)),
        ),
        compiler_params=pltpu.CompilerParams(
            dimension_semantics=("parallel",),         # v7x: shard batch over 2 TCs
        ),
        cost_estimate=pl.CostEstimate(
            flops=2 * B * H * (Din + 1),
            transcendentals=2 * B,                     # two sigmoids per sample
            bytes_accessed=B * Din * act_bytes + Din * H * act_bytes
            + 3 * H * 4 + 2 * B * 4,
        ),
    )(act, w1a, params, noise)

    return out_row.reshape(B, 1)


def init_decoder_params(key, in_features, hidden_size):
    """Deterministic PyTorch-style (uniform +/- 1/sqrt(fan_in)) Linear init."""
    k1, k2, k3, k4 = jax.random.split(key, 4)
    bound1 = 1.0 / math.sqrt(in_features)
    w1 = jax.random.uniform(k1, (in_features, hidden_size), jnp.float32, -bound1, bound1)
    b1 = jax.random.uniform(k2, (1, hidden_size), jnp.float32, -bound1, bound1)
    bound2 = 1.0 / math.sqrt(hidden_size)
    w2 = jax.random.uniform(k3, (hidden_size, 1), jnp.float32, -bound2, bound2)
    b2 = jax.random.uniform(k4, (1, 1), jnp.float32, -bound2, bound2)
    return w1, b1, w2, b2


if __name__ == "__main__":
    key = jax.random.PRNGKey(0)
    k_in, k_par, k_noise = jax.random.split(key, 3)

    batch = 256          # single (256, 32) tile on v5e/v6e; 2 x (128, 32) on v7x
    in_features = 32     # LazyLinear infers this from the input's last dim
    hidden_size = 32
    temperature = 0.5

    n_h = jax.random.normal(k_in, (batch, in_features), jnp.float32)
    w1, b1, w2, b2 = init_decoder_params(k_par, in_features, hidden_size)

    n_o = decoder_forward(n_h, w1, b1, w2, b2, temperature, k_noise)
    n_o = jax.block_until_ready(n_o)

    assert n_o.shape == (batch, 1)
    assert bool(jnp.all(jnp.isfinite(n_o)))
    assert bool(jnp.all((n_o > 0.0) & (n_o < 1.0)))
    print("KERNEL_OK")
</pallas_src>

<mosaic_0001>
module attributes {stable_mosaic.version = 11 : i64} {
  func.func @_decoder_kernel(%arg0: i32, %arg1: memref<256x32xbf16, #tpu.memory_space<vmem>>, %arg2: memref<32x32xbf16, #tpu.memory_space<vmem>>, %arg3: memref<3x32xf32, #tpu.memory_space<vmem>>, %arg4: memref<1x256xf32, #tpu.memory_space<vmem>>, %arg5: memref<1x256xf32, #tpu.memory_space<vmem>>) attributes {dimension_semantics = [#tpu.dimension_semantics<parallel>], iteration_bounds = array<i64: 1>, scalar_prefetch = 0 : i64, scratch_operands = 0 : i64, tpu.core_type = #tpu.core_type<tc>, window_params = [{transform_indices = @transform_0, window_bounds = array<i64: 256, 32>}, {pipeline_mode = #tpu.pipeline_mode<synchronous>, transform_indices = @transform_1, window_bounds = array<i64: 32, 32>}, {pipeline_mode = #tpu.pipeline_mode<synchronous>, transform_indices = @transform_2, window_bounds = array<i64: 3, 32>}, {transform_indices = @transform_3, window_bounds = array<i64: 1, 256>}, {transform_indices = @transform_4, window_bounds = array<i64: 1, 256>}]} {
    %c0 = arith.constant 0 : index
    %c0_0 = arith.constant 0 : index
    %0 = vector.load %arg1[%c0, %c0_0] : memref<256x32xbf16, #tpu.memory_space<vmem>>, vector<256x32xbf16>
    %c0_1 = arith.constant 0 : index
    %c0_2 = arith.constant 0 : index
    %1 = vector.load %arg3[%c0_1, %c0_2] : memref<3x32xf32, #tpu.memory_space<vmem>>, vector<1x32xf32>
    %c1 = arith.constant 1 : index
    %c0_3 = arith.constant 0 : index
    %2 = vector.load %arg3[%c1, %c0_3] : memref<3x32xf32, #tpu.memory_space<vmem>>, vector<1x32xf32>
    %c2 = arith.constant 2 : index
    %c0_4 = arith.constant 0 : index
    %3 = vector.load %arg3[%c2, %c0_4] : memref<3x32xf32, #tpu.memory_space<vmem>>, vector<1x1xf32>
    %c0_5 = arith.constant 0 : index
    %c0_6 = arith.constant 0 : index
    %4 = vector.load %arg2[%c0_5, %c0_6] : memref<32x32xbf16, #tpu.memory_space<vmem>>, vector<32x32xbf16>
    %cst = arith.constant dense<0.000000e+00> : vector<256x32xf32>
    %5 = tpu.matmul %0, %4, %cst {dimension_numbers = #tpu.dot_dimension_numbers<[1], [0], [0], [1], [0, 0, 1, 1], [], []>} : vector<256x32xbf16>, vector<32x32xbf16>, vector<256x32xf32> -> vector<256x32xf32>
    %6 = vector.broadcast %1 : vector<1x32xf32> to vector<256x32xf32>
    %7 = arith.addf %5, %6 : vector<256x32xf32>
    %cst_7 = arith.constant 0.00999999977 : f32
    %8 = vector.broadcast %cst_7 : f32 to vector<256x32xf32>
    %9 = arith.mulf %8, %7 : vector<256x32xf32>
    %10 = arith.maximumf %7, %9 : vector<256x32xf32>
    %cst_8 = arith.constant dense<0.000000e+00> : vector<1x256xf32>
    %11 = tpu.matmul %2, %10, %cst_8 {dimension_numbers = #tpu.dot_dimension_numbers<[1], [1], [0], [0], [0, 0, 1, 0], [], []>} : vector<1x32xf32>, vector<256x32xf32>, vector<1x256xf32> -> vector<1x256xf32>
    %12 = vector.broadcast %3 : vector<1x1xf32> to vector<1x256xf32>
    %13 = arith.addf %11, %12 : vector<1x256xf32>
    %14 = arith.negf %13 : vector<1x256xf32>
    %15 = math.exp %14 : vector<1x256xf32>
    %cst_9 = arith.constant 1.000000e+00 : f32
    %16 = vector.broadcast %cst_9 : f32 to vector<1x256xf32>
    %17 = arith.addf %16, %15 : vector<1x256xf32>
    %18 = arith.divf %16, %17 : vector<1x256xf32>
    %c0_10 = arith.constant 0 : index
    %c0_11 = arith.constant 0 : index
    %19 = vector.load %arg4[%c0_10, %c0_11] : memref<1x256xf32, #tpu.memory_space<vmem>>, vector<1x256xf32>
    %20 = arith.addf %18, %19 : vector<1x256xf32>
    %cst_12 = arith.constant 2.000000e+00 : f32
    %21 = vector.broadcast %cst_12 : f32 to vector<1x256xf32>
    %22 = arith.mulf %20, %21 : vector<1x256xf32>
    %23 = arith.negf %22 : vector<1x256xf32>
    %24 = math.exp %23 : vector<1x256xf32>
    %cst_13 = arith.constant 1.000000e+00 : f32
    %25 = vector.broadcast %cst_13 : f32 to vector<1x256xf32>
    %26 = arith.addf %25, %24 : vector<1x256xf32>
    %27 = arith.divf %25, %26 : vector<1x256xf32>
    %c0_14 = arith.constant 0 : index
    %c0_15 = arith.constant 0 : index
    %28 = vector.load %arg5[%c0_14, %c0_15] : memref<1x256xf32, #tpu.memory_space<vmem>>, vector<1x256xf32>
    tpu.vector_store %arg5[%c0_14, %c0_15], %27 {strides = array<i32>} : memref<1x256xf32, #tpu.memory_space<vmem>>, vector<1x256xf32>,
    return
  }
  func.func @transform_0(%arg0: i32) -> (i32, i32) {
    %c0_i32 = arith.constant 0 : i32
    %c0_i32_0 = arith.constant 0 : i32
    return %arg0, %c0_i32 : i32, i32
  }
  func.func @transform_1(%arg0: i32) -> (i32, i32) {
    %c0_i32 = arith.constant 0 : i32
    %c0_i32_0 = arith.constant 0 : i32
    %c0_i32_1 = arith.constant 0 : i32
    return %c0_i32, %c0_i32_0 : i32, i32
  }
  func.func @transform_2(%arg0: i32) -> (i32, i32) {
    %c0_i32 = arith.constant 0 : i32
    %c0_i32_0 = arith.constant 0 : i32
    %c0_i32_1 = arith.constant 0 : i32
    return %c0_i32, %c0_i32_0 : i32, i32
  }
  func.func @transform_3(%arg0: i32) -> (i32, i32) {
    %c0_i32 = arith.constant 0 : i32
    %c0_i32_0 = arith.constant 0 : i32
    return %c0_i32, %arg0 : i32, i32
  }
  func.func @transform_4(%arg0: i32) -> (i32, i32) {
    %c0_i32 = arith.constant 0 : i32
    %c0_i32_0 = arith.constant 0 : i32
    return %c0_i32, %arg0 : i32, i32
  }
}

</mosaic_0001>

<bundles_post_ra>
// kernel: tpu_custom_call.1
= control target key start
LH: loop header
LB: loop body
LE: loop exit
PB: predicated region body
PF: predicated region fallthrough
CT: control target
= control target key end

     0   :  { %vm154_vm0 = vcmask 261120   ;;  %s1174_s0 = inlined_call_operand.vmem [shape: bf16[256,32], index: 0, kind: input, shape index: {}]   ;;  %s1175_s1 = inlined_call_operand.vmem [shape: bf16[32,32], index: 1, kind: input, shape index: {}]   ;;  %s1176_s2 = inlined_call_operand.vmem [shape: f32[3,32], index: 2, kind: input, shape index: {}]   ;;  %s1177_s3 = inlined_call_operand.vmem [shape: f32[1,256], index: 3, kind: input, shape index: {}]   ;;  %s1178_s4 = inlined_call_operand.hbm [shape: f32[1,256], index: 4, kind: output, shape index: {}]  }
   0x1   :  { %v892_v0 = vld [vmem:[%s1175_s1] sm:$0xff]   ;;  %v893_v1 = vld [vmem:[%s1175_s1 + $0x8] sm:$0xff]   ;;  %v896_v4 = vld [vmem:[%s1174_s0 + $0x10] sm:$0xff]  }
   0x2   :  { %804 = vmatprep.subr.bf16.mxu0 %v892_v0  ;;  %v894_v2 = vld [vmem:[%s1174_s0] sm:$0xff]   ;;  %v895_v3 = vld [vmem:[%s1174_s0 + $0x8] sm:$0xff]   ;;  %v897_v5 = vld [vmem:[%s1174_s0 + $0x18] sm:$0xff]  }
   0x3   :  { %805 = vmatpush3.bf16.msra.mxu0 %v892_v0  ;;  %808 = vmatprep.mubr.msk.bf16.mxu0 %vm154_vm0, %v894_v2  ;;  %v898_v6 = vld [vmem:[%s1174_s0 + $0x20] sm:$0xff]  }
   0x4   :  { %806 = vmatprep.subr.bf16.mxu0 %v893_v1 }
   0x7   :  { %807 = vmatpush3.bf16.msra.mxu0 %v893_v1 }
   0xa   :  { %809 = vmatmul.mubr.msk.bf16.vlgmr.msra.gmra.mrb[0].mxu0 %vm154_vm0, %v895_v3 }
   0xb   :  { %812 = vmatprep.mubr.msk.bf16.mxu0 %vm154_vm0, %v896_v4 }
  0x12   :  { %813 = vmatmul.mubr.msk.bf16.gmra.mrb[4].mxu0 %vm154_vm0, %v897_v5 }
  0x13   :  { %9 = vsyncpa [#allocation3], 0  ;;  %816 = vmatprep.mubr.msk.bf16.mxu0 %vm154_vm0, %v898_v6  ;;  %v899_v7 = vld [vmem:[%s1174_s0 + $0x28] sm:$0xff]   ;;  %v900_v8 = vld [vmem:[%s1174_s0 + $0x30] sm:$0xff]   ;;  %v950_v20 = vmov 0  }
  0x14   :  { %v901_v9 = vld [vmem:[%s1174_s0 + $0x38] sm:$0xff]   ;;  %v902_v10 = vld [vmem:[%s1174_s0 + $0x40] sm:$0xff]   ;;  %v903_v11 = vld [vmem:[%s1174_s0 + $0x48] sm:$0xff]   ;;  %891 = vset.pattern.permute.xlu0 %v950_v20 }
  0x15   :  { %v904_v12 = vld [vmem:[%s1174_s0 + $0x50] sm:$0xff]   ;;  %v905_v13 = vld [vmem:[%s1174_s0 + $0x58] sm:$0xff]   ;;  %v906_v14 = vld [vmem:[%s1174_s0 + $0x60] sm:$0xff]  }
  0x16   :  { %v907_v15 = vld [vmem:[%s1174_s0 + $0x68] sm:$0xff]   ;;  %v908_v16 = vld [vmem:[%s1174_s0 + $0x70] sm:$0xff]   ;;  %v909_v17 = vld [vmem:[%s1174_s0 + $0x78] sm:$0xff]  }
  0x17   :  { %v1051_v18 = vld [vmem:[%s1176_s2 + $0x1] sm:$0x1]  ;;  %v53_v19 = vld [vmem:[%s1176_s2 + $0x2] sm:$0x1]  ;;  %v1061_v21 = vld [vmem:[%s1176_s2] ss:$0 sm:$0xff] }
  0x18   :  { %802 = vmatprep.mubr.msk.f32.mxu1 %vm154_vm0, %v1051_v18  ;;  %430 = vperm.xlu0 %891, %v53_v19   ;;  %vm1102_vm1 = vmpackc.low %vm154_vm0, %vm154_vm0 }
  0x1a   :  { %817 = vmatmul.mubr.msk.bf16.gmra.mrb[8].mxu0 %vm154_vm0, %v899_v7 }
  0x1b   :  { %820 = vmatprep.mubr.msk.bf16.mxu0 %vm154_vm0, %v900_v8 }
  0x22   :  { %821 = vmatmul.mubr.msk.bf16.gmra.mrb[12].mxu0 %vm154_vm0, %v901_v9 }
  0x23   :  { %824 = vmatprep.mubr.msk.bf16.mxu0 %vm154_vm0, %v902_v10 }
  0x2a   :  { %825 = vmatmul.mubr.msk.bf16.gmra.mrb[16].mxu0 %vm154_vm0, %v903_v11 }
  0x2b   :  { %828 = vmatprep.mubr.msk.bf16.mxu0 %vm154_vm0, %v904_v12 }
  0x32   :  { %829 = vmatmul.mubr.msk.bf16.gmra.mrb[20].mxu0 %vm154_vm0, %v905_v13 }
  0x33   :  { %832 = vmatprep.mubr.msk.bf16.mxu0 %vm154_vm0, %v906_v14 }
  0x3a   :  { %833 = vmatmul.mubr.msk.bf16.gmra.mrb[24].mxu0 %vm154_vm0, %v907_v15 }
  0x3b   :  { %836 = vmatprep.mubr.msk.bf16.mxu0 %vm154_vm0, %v908_v16 }
  0x42   :  { %837 = vmatmul.mubr.msk.bf16.gmra.mrb[28].mxu0 %vm154_vm0, %v909_v17 }
  0xdd   :  { %v810_v22 = vpop.f32.mrb[0].mxu0 }
  0xde   :  { %v246_v23 = vadd.f32 %v810_v22, %v1061_v21  ;;  %v237_v24 = vpop.f32.mrb[1].mxu0 }
  0xdf   :  { %v238_v25 = vadd.f32 %v1061_v21, %v237_v24  ;;  %v811_v26 = vpop.f32.mrb[2].mxu0 }
  0xe0   :  { %v366_v27 = vmul.f32 0.01, %v246_v23  ;;  %v249_v28 = vadd.f32 %v811_v26, %v1061_v21  ;;  %v240_v29 = vpop.f32.mrb[3].mxu0 }
  0xe1   :  { %v364_v30 = vmul.f32 0.01, %v238_v25  ;;  %v241_v31 = vadd.f32 %v1061_v21, %v240_v29 }
  0xe2   :  { %v367_v32 = vmul.f32 0.01, %v249_v28  ;;  %v398_v34 = vmax.f32 %v246_v23, %v366_v27 }
  0xe3   :  { %v365_v33 = vmul.f32 0.01, %v241_v31  ;;  %v396_v36 = vmax.f32 %v238_v25, %v364_v30 }
  0xe4   :  { %v399_v35 = vmax.f32 %v249_v28, %v367_v32 }
  0xe5   :  { %v397_v37 = vmax.f32 %v241_v31, %v365_v33  ;;  %v814_v38 = vpop.f32.mrb[4].mxu0 }
  0xe6   :  { %v1067_v39 = vpack.c.bf16 %v399_v35, %v398_v34  ;;  %v262_v40 = vadd.f32 %v814_v38, %v1061_v21  ;;  %v253_v41 = vpop.f32.mrb[5].mxu0 }
  0xe7   :  { %v254_v42 = vadd.f32 %v1061_v21, %v253_v41  ;;  %v815_v43 = vpop.f32.mrb[6].mxu0  ;;  %v1071_v44 = vpack.c.bf16 %v397_v37, %v396_v36 }
  0xe8   :  { %v370_v45 = vmul.f32 0.01, %v262_v40  ;;  %v265_v46 = vadd.f32 %v815_v43, %v1061_v21  ;;  %v256_v47 = vpop.f32.mrb[7].mxu0 }
  0xe9   :  { %v368_v48 = vmul.f32 0.01, %v254_v42  ;;  %v257_v49 = vadd.f32 %v1061_v21, %v256_v47 }
  0xea   :  { %v371_v50 = vmul.f32 0.01, %v265_v46  ;;  %v402_v52 = vmax.f32 %v262_v40, %v370_v45 }
  0xeb   :  { %v369_v51 = vmul.f32 0.01, %v257_v49  ;;  %v400_v54 = vmax.f32 %v254_v42, %v368_v48 }
  0xec   :  { %v403_v53 = vmax.f32 %v265_v46, %v371_v50 }
  0xed   :  { %v401_v55 = vmax.f32 %v257_v49, %v369_v51  ;;  %v818_v56 = vpop.f32.mrb[8].mxu0 }
  0xee   :  { %v1075_v57 = vpack.c.bf16 %v403_v53, %v402_v52  ;;  %v278_v58 = vadd.f32 %v818_v56, %v1061_v21  ;;  %v269_v59 = vpop.f32.mrb[9].mxu0 }
  0xef   :  { %v1078_v60 = vpack.c.bf16 %v401_v55, %v400_v54  ;;  %v270_v61 = vadd.f32 %v1061_v21, %v269_v59  ;;  %v819_v62 = vpop.f32.mrb[10].mxu0 }
  0xf0   :  { %v374_v63 = vmul.f32 0.01, %v278_v58  ;;  %v281_v0 = vadd.f32 %v819_v62, %v1061_v21  ;;  %v272_v1 = vpop.f32.mrb[11].mxu0 }
  0xf1   :  { %v372_v2 = vmul.f32 0.01, %v270_v61  ;;  %v273_v3 = vadd.f32 %v1061_v21, %v272_v1 }
  0xf2   :  { %v375_v4 = vmul.f32 0.01, %v281_v0  ;;  %v406_v6 = vmax.f32 %v278_v58, %v374_v63 }
  0xf3   :  { %v373_v5 = vmul.f32 0.01, %v273_v3  ;;  %v404_v8 = vmax.f32 %v270_v61, %v372_v2 }
  0xf4   :  { %v407_v7 = vmax.f32 %v281_v0, %v375_v4 }
  0xf5   :  { %v405_v9 = vmax.f32 %v273_v3, %v373_v5  ;;  %v822_v10 = vpop.f32.mrb[12].mxu0 }
  0xf6   :  { %v1083_v11 = vpack.c.bf16 %v407_v7, %v406_v6  ;;  %v294_v12 = vadd.f32 %v822_v10, %v1061_v21  ;;  %v285_v13 = vpop.f32.mrb[13].mxu0 }
  0xf7   :  { %v1086_v14 = vpack.c.bf16 %v405_v9, %v404_v8  ;;  %v286_v15 = vadd.f32 %v1061_v21, %v285_v13  ;;  %v823_v16 = vpop.f32.mrb[14].mxu0 }
  0xf8   :  { %v378_v17 = vmul.f32 0.01, %v294_v12  ;;  %v297_v19 = vadd.f32 %v823_v16, %v1061_v21  ;;  %v288_v20 = vpop.f32.mrb[15].mxu0 }
  0xf9   :  { %v376_v22 = vmul.f32 0.01, %v286_v15  ;;  %v289_v23 = vadd.f32 %v1061_v21, %v288_v20 }
  0xfa   :  { %v379_v24 = vmul.f32 0.01, %v297_v19  ;;  %v410_v26 = vmax.f32 %v294_v12, %v378_v17 }
  0xfb   :  { %v377_v25 = vmul.f32 0.01, %v289_v23  ;;  %v408_v28 = vmax.f32 %v286_v15, %v376_v22 }
  0xfc   :  { %v411_v27 = vmax.f32 %v297_v19, %v379_v24 }
  0xfd   :  { %v409_v29 = vmax.f32 %v289_v23, %v377_v25  ;;  %v826_v30 = vpop.f32.mrb[16].mxu0 }
  0xfe   :  { %v1091_v31 = vpack.c.bf16 %v411_v27, %v410_v26  ;;  %v310_v32 = vadd.f32 %v826_v30, %v1061_v21  ;;  %v301_v33 = vpop.f32.mrb[17].mxu0 }
  0xff   :  { %v1094_v34 = vpack.c.bf16 %v409_v29, %v408_v28  ;;  %v302_v35 = vadd.f32 %v1061_v21, %v301_v33  ;;  %v827_v36 = vpop.f32.mrb[18].mxu0 }
 0x100   :  { %v382_v37 = vmul.f32 0.01, %v310_v32  ;;  %v313_v38 = vadd.f32 %v827_v36, %v1061_v21  ;;  %v304_v40 = vpop.f32.mrb[19].mxu0 }
 0x101   :  { %v380_v41 = vmul.f32 0.01, %v302_v35  ;;  %v305_v42 = vadd.f32 %v1061_v21, %v304_v40 }
 0x102   :  { %v383_v43 = vmul.f32 0.01, %v313_v38  ;;  %v414_v46 = vmax.f32 %v310_v32, %v382_v37 }
 0x103   :  { %v381_v45 = vmul.f32 0.01, %v305_v42  ;;  %v412_v48 = vmax.f32 %v302_v35, %v380_v41 }
 0x104   :  { %v415_v47 = vmax.f32 %v313_v38, %v383_v43 }
 0x105   :  { %v413_v49 = vmax.f32 %v305_v42, %v381_v45  ;;  %v830_v50 = vpop.f32.mrb[20].mxu0 }
 0x106   :  { %v846_v51 = vpack.c.bf16 %v415_v47, %v414_v46  ;;  %v326_v52 = vadd.f32 %v830_v50, %v1061_v21  ;;  %v317_v53 = vpop.f32.mrb[21].mxu0 }
 0x107   :  { %v318_v55 = vadd.f32 %v1061_v21, %v317_v53  ;;  %v840_v56 = vpack.c.bf16 %v413_v49, %v412_v48  ;;  %v831_v58 = vpop.f32.mrb[22].mxu0 }
 0x108   :  { %v386_v59 = vmul.f32 0.01, %v326_v52  ;;  %v329_v61 = vadd.f32 %v831_v58, %v1061_v21  ;;  %v320_v62 = vpop.f32.mrb[23].mxu0 }
 0x109   :  { %v384_v63 = vmul.f32 0.01, %v318_v55  ;;  %842 = vmatprep.subr.msk.bf16.mxu1 %vm1102_vm1, %v840_v56  ;;  %v321_v0 = vadd.f32 %v1061_v21, %v320_v62 }
 0x10a   :  { %v418_v1 = vmax.f32 %v326_v52, %v386_v59  ;;  %v387_v2 = vmul.f32 0.01, %v329_v61  ;;  %845 = vmatpush3.bf16.xpose.msk.msra.mxu1 %vm1102_vm1, %v1071_v44 }
 0x10b   :  { %v416_v3 = vmax.f32 %v318_v55, %v384_v63  ;;  %v385_v4 = vmul.f32 0.01, %v321_v0  ;;  %848 = vmatprep.subr.msk.bf16.mxu1 %vm1102_vm1, %v846_v51 }
 0x10c   :  { %v419_v5 = vmax.f32 %v329_v61, %v387_v2 }
 0x10d   :  { %v417_v6 = vmax.f32 %v321_v0, %v385_v4  ;;  %v834_v7 = vpop.f32.mrb[24].mxu0 }
 0x10e   :  { %v858_v8 = vpack.c.bf16 %v419_v5, %v418_v1  ;;  %v342_v9 = vadd.f32 %v834_v7, %v1061_v21  ;;  %v333_v10 = vpop.f32.mrb[25].mxu0 }
 0x10f   :  { %v852_v12 = vpack.c.bf16 %v417_v6, %v416_v3  ;;  %v334_v13 = vadd.f32 %v1061_v21, %v333_v10  ;;  %v835_v15 = vpop.f32.mrb[26].mxu0 }
 0x110   :  { %v390_v16 = vmul.f32 0.01, %v342_v9  ;;  %v345_v17 = vadd.f32 %v835_v15, %v1061_v21  ;;  %v336_v44 = vpop.f32.mrb[27].mxu0 }
 0x111   :  { %v388_v19 = vmul.f32 0.01, %v334_v13  ;;  %v337_v20 = vadd.f32 %v1061_v21, %v336_v44 }
 0x112   :  { %851 = vmatpush3.bf16.xpose.msk.msra.mxu1 %vm1102_vm1, %v1067_v39  ;;  %v422_v22 = vmax.f32 %v342_v9, %v390_v16  ;;  %v391_v23 = vmul.f32 0.01, %v345_v17 }
 0x113   :  { %854 = vmatprep.subr.msk.bf16.mxu1 %vm1102_vm1, %v852_v12  ;;  %v420_v24 = vmax.f32 %v334_v13, %v388_v19  ;;  %v389_v25 = vmul.f32 0.01, %v337_v20  ;;  %v951_v12 = vmov 1966171168  }
 0x114   :  { %v423_v26 = vmax.f32 %v345_v17, %v391_v23  ;;  %v647_v13 = vunpack.c.l.s4 %v951_v12 }
 0x115   :  { %v421_v27 = vmax.f32 %v337_v20, %v389_v25  ;;  %v838_v28 = vpop.f32.mrb[28].mxu0 }
 0x116   :  { %v870_v29 = vpack.c.bf16 %v423_v26, %v422_v22  ;;  %v358_v30 = vadd.f32 %v838_v28, %v1061_v21  ;;  %v349_v32 = vpop.f32.mrb[29].mxu0  ;;  %v648_v15 = vunpack.c.0.s8 %v647_v13 }
 0x117   :  { %v864_v33 = vpack.c.bf16 %v421_v27, %v420_v24  ;;  %v350_v35 = vadd.f32 %v1061_v21, %v349_v32  ;;  %v839_v36 = vpop.f32.mrb[30].mxu0 }
 0x118   :  { %v394_v37 = vmul.f32 0.01, %v358_v30  ;;  %v361_v39 = vadd.f32 %v839_v36, %v1061_v21  ;;  %v352_v38 = vpop.f32.mrb[31].mxu0 }
 0x119   :  { %v392_v40 = vmul.f32 0.01, %v350_v35  ;;  %v353_v41 = vadd.f32 %v1061_v21, %v352_v38  ;;  %v431_v21 = vpop.permute.xlu0 %430 }
 0x11a   :  { %857 = vmatpush3.bf16.xpose.msk.msra.mxu1 %vm1102_vm1, %v1078_v60  ;;  %v426_v42 = vmax.f32 %v358_v30, %v394_v37  ;;  %v395_v43 = vmul.f32 0.01, %v361_v39 }
 0x11b   :  { %860 = vmatprep.subr.msk.bf16.mxu1 %vm1102_vm1, %v858_v8  ;;  %v424_v45 = vmax.f32 %v350_v35, %v392_v40  ;;  %v393_v46 = vmul.f32 0.01, %v353_v41 }
 0x11c   :  { %v427_v47 = vmax.f32 %v361_v39, %v395_v43 }
 0x11d   :  { %v425_v48 = vmax.f32 %v353_v41, %v393_v46 }
 0x11e   :  { %v882_v49 = vpack.c.bf16 %v427_v47, %v426_v42 }
 0x11f   :  { %v876_v50 = vpack.c.bf16 %v425_v48, %v424_v45 }
 0x122   :  { %863 = vmatpush3.bf16.xpose.msk.msra.mxu1 %vm1102_vm1, %v1075_v57 }
 0x123   :  { %866 = vmatprep.subr.msk.bf16.mxu1 %vm1102_vm1, %v864_v33 }
 0x12a   :  { %869 = vmatpush3.bf16.xpose.msk.msra.mxu1 %vm1102_vm1, %v1086_v14 }
 0x12b   :  { %872 = vmatprep.subr.msk.bf16.mxu1 %vm1102_vm1, %v870_v29 }
 0x132   :  { %875 = vmatpush3.bf16.xpose.msk.msra.mxu1 %vm1102_vm1, %v1083_v11 }
 0x133   :  { %878 = vmatprep.subr.msk.bf16.mxu1 %vm1102_vm1, %v876_v50 }
 0x13a   :  { %881 = vmatpush3.bf16.xpose.msk.msra.mxu1 %vm1102_vm1, %v1094_v34  ;;  %v617_v34 = vlaneseq }
 0x13b   :  { %884 = vmatprep.subr.msk.bf16.mxu1 %vm1102_vm1, %v882_v49 }
 0x13c   :  { %v618_v59 = vshrl.u32 %v617_v34, 7  ;;  %vm663_vm2 = vcmp.lt.s32.totalorder %v617_v34, 256 }
 0x13e   :  { %v623_v54 = vsub.s32 1, %v618_v59  ;;  %v651_v17 = vsub.s32 %v648_v15, %v618_v59 }
 0x142   :  { %887 = vmatpush3.bf16.xpose.msk.msra.mxu1 %vm1102_vm1, %v1091_v31  ;;  %v619_v31 = vsub.s32 0, %v618_v59 }
 0x149   :  { %803 = vmatmul.mubr.msk.f32.vlgmr.msra.gmra.mrb[0].mxu1 %vm154_vm0, %v1051_v18  ;;  %v615_v18 = vld [vmem:[%s1177_s3] sm:$0x3]  ;;  %s952_s3 = smov [#allocation2]  }
 0x14a   :  { %v620_v61 = vrot.slane %v615_v18, %v619_v31  ;;  %v624_v62 = vrot.slane %v615_v18, %v623_v54  ;;  %s672_s29 = sshll.u32 %s952_s3, 4  ;;  %s673_s29 = int_to_ptr.vmem [resolvable:$true] %s672_s29 }
 0x14b   :  { %s926_s30 = scalar_lea.vmem %s673_s29, 32  ;;  %p931_p1 = scmp.lt.s32.totalorder %s673_s29, %s673_s29 }
 0x14c   :  { %p927_p0 = scmp.ne.s32.totalorder %s673_s29, %s926_s30  ;;  %p932_p2 = scmp.lt.s32.totalorder %s926_s30, %s926_s30 }
 0x14e   :  { %p933_p3 = por %p932_p2, %p931_p1 }
 0x150   :  { %p934_p4 = pnand %p933_p3, %p927_p0 }
 0x21c   :  { %v598_v57 = vpop.f32.mrb[0].mxu1 }
 0x21d   :  { %v599_v60 = vadd.f32 %v598_v57, %v431_v21  ;;  %v600_v11 = vpop.f32.mrb[1].mxu1 }
 0x21e   :  { %v601_v14 = vadd.f32 %v600_v11, %v431_v21 }
 0x21f   :  { %v748_v51 = vmul.f32 -1.442695, %v599_v60 }
 0x220   :  { %v749_v52 = vmul.f32 -1.442695, %v601_v14 }
 0x221   :  { %910 = vpow2.f32 %v748_v51 }
 0x222   :  { %912 = vpow2.f32 %v749_v52 }
 0x22b   :  { %v911_v53 = vpop.eup %910 }
 0x22c   :  { %v913_v55 = vpop.eup %912  ;;  %v609_v56 = vadd.f32 1.0, %v911_v53 }
 0x22d   :  { %v610_v58 = vadd.f32 1.0, %v913_v55 }
 0x22e   :  { %914 = vrcp.f32 %v609_v56 }
 0x22f   :  { %916 = vrcp.f32 %v610_v58 }
 0x238   :  { %v915_v63 = vpop.eup %914 }
 0x239   :  { %v917_v0 = vpop.eup %916  ;;  %v627_v1 = vadd.f32 %v915_v63, %v620_v61 }
 0x23a   :  { %v628_v2 = vadd.f32 %v917_v0, %v624_v62 }
 0x23b   :  { %v750_v3 = vmul.f32 -2.0, %v627_v1 }
 0x23c   :  { %v751_v4 = vmul.f32 -2.0, %v628_v2 }
 0x23d   :  { %v633_v5 = vmul.f32 1.442695, %v750_v3 }
 0x23e   :  { %v635_v6 = vmul.f32 1.442695, %v751_v4 }
 0x23f   :  { %918 = vpow2.f32 %v633_v5 }
 0x240   :  { %920 = vpow2.f32 %v635_v6 }
 0x249   :  { %v919_v7 = vpop.eup %918 }
 0x24a   :  { %v921_v8 = vpop.eup %920  ;;  %v637_v9 = vadd.f32 1.0, %v919_v7 }
 0x24b   :  { %v638_v10 = vadd.f32 1.0, %v921_v8 }
 0x24c   :  { %922 = vrcp.f32 %v637_v9 }
 0x24d   :  { %924 = vrcp.f32 %v638_v10 }
 0x256   :  { %v923_v16 = vpop.eup %922 }
 0x257   :  { %v925_v44 = vpop.eup %924 }
 0x258   :  { %v645_v19 = vcombine.low %v923_v16, %v925_v44 }
 0x25a   :  { %v652_v20 = vrot.slane %v645_v19, %v651_v17 }
 0x25c   :  { %v659_v22 = vrot.slane %v652_v20, %v651_v17 }
 0x25e   :  { %665 = vst.msk [vmem:[#allocation2] sm:$0x3] %vm663_vm2, %v659_v22 }
 0x25f   :  { %937 = shalt.err (!%p934_p4)
}
 0x260   :  { %s938_s7 = scalar_lea.hbm %s1178_s4, 32 }
 0x261   :  { %p939_p5 = scmp.ne.s32.totalorder %s1178_s4, %s938_s7  ;;  %p942_p6 = scmp.lt.u32.totalorder %s938_s7, %s1178_s4 }
 0x263   :  { %p944_p7 = pnand %p942_p6, %p939_p5 }
 0x265   :  { %947 = shalt.err (!%p944_p7)
}
 0x266   :  { %675 = dma.vmem_to_hbm [thread:$0]  %s673_s29, 32, %s1178_s4, [#allocation3]  }
 0x267   :  { %948 = dma.done.wait [#allocation3], 32  }
 0x268   :  { %949 = vsyncadd [#allocation3], 4294967264 }
 0x269   :  { %679 = vsyncpa [#allocation3], 1 }

</bundles_post_ra>
